<compile_context>
chip_gen: v6e
topology: v6e:2x2x1
jax: 0.10.0
libtpu: 0.0.40
codegen_flags: <defaults>
</compile_context>

<pallas_src>
import jax
import jax.numpy as jnp
from jax import lax
from jax.experimental import pallas as pl
from jax.experimental.pallas import tpu as pltpu

# ---------------- module hyper-parameters (PyTorch defaults) ----------------
INPUT_DIM = 19
INTER_DIM = 15
OUTPUT_DIM = 15
KSIZE = 3
D1 = 1
D2 = 2
PAD1 = (KSIZE - 1) * D1  # 2
PAD2 = (KSIZE - 1) * D2  # 4
EPS = 1e-5

# Lane-dense output width: 15-lane masked vst.msk -> unmasked 128-lane vst.
OUT_PAD = 128

# MXU operand dtype. bf16 is native on the v5e/v6e/v7x MXU (f32 operands cost
# ~3x the vmatmul passes) and halves the dominant input-tile DMA bytes.
# Elementwise / LayerNorm math stays f32 regardless.
MXU_DTYPE = jnp.bfloat16

# small example shapes
BATCH = 2
T = 16


def temporal_block_kernel(x_ref, w1_ref, w2_ref, p_ref, o_ref):
  """Fused TemporalBlock forward for one block of batch elements.

  x_ref : (B_blk, T, Cin)      raw input block (MXU dtype)
  w1_ref: (K, Cin, C1)         conv1 weight, tap-major (MXU dtype)
  w2_ref: (K, C1,  C2)         conv2 weight, tap-major (MXU dtype)
  p_ref : (6, Cmax)            rows: b1, g1, be1, b2, g2, be2 (f32)
  o_ref : (B_blk, T, OUT_PAD)  lane-dense output; lanes >= OUTPUT_DIM are 0
  """
  b_blk, t_len, cin = x_ref.shape
  rows = b_blk * t_len

  p = p_ref[...]
  b1, g1, be1 = p[0:1, :INTER_DIM], p[1:2, :INTER_DIM], p[2:3, :INTER_DIM]
  b2, g2, be2 = p[3:4, :OUTPUT_DIM], p[4:5, :OUTPUT_DIM], p[5:6, :OUTPUT_DIM]

  # Local time index of each flattened (batch*time) row.  The `t_local >= s`
  # mask below zeroes rows whose rolled source wrapped from a different batch
  # element — this IS the causal zero left-padding of the dilated conv.
  t_local = lax.broadcasted_iota(jnp.int32, (rows, 1), 0) % t_len

  def causal_conv(a, w_ref, dil, c_out):
    """K accumulating (rows, Cin)@(Cin, Cout) MXU matmuls. `a` is f32."""
    acc = jnp.zeros((rows, c_out), jnp.float32)
    for k in range(KSIZE):
      s = (KSIZE - 1 - k) * dil  # causal time shift (steps) for tap k
      if s == 0:
        tap = a
      else:
        shifted = pltpu.roll(a, shift=s, axis=0)  # XLU slot — near free
        tap = jnp.where(t_local >= s, shifted, jnp.zeros_like(shifted))
      acc += jnp.dot(tap.astype(w_ref.dtype), w_ref[k],
                     preferred_element_type=jnp.float32)
    return acc

  def layer_norm_relu(a, bias, g, be):
    a = a + bias
    mu = jnp.mean(a, axis=-1, keepdims=True)
    var = jnp.mean(jnp.square(a - mu), axis=-1, keepdims=True)
    return jnp.maximum((a - mu) * lax.rsqrt(var + EPS) * g + be, 0.0)

  # ---- conv1 -> LayerNorm -> ReLU (dropout == identity) ----
  x = x_ref[...].astype(jnp.float32).reshape(rows, cin)
  h = layer_norm_relu(causal_conv(x, w1_ref, D1, INTER_DIM), b1, g1, be1)

  # ---- conv2 -> LayerNorm -> ReLU ----
  y = layer_norm_relu(causal_conv(h, w2_ref, D2, OUTPUT_DIM), b2, g2, be2)

  # Lane-dense store: pad channels 15 -> OUT_PAD so the vst is unmasked.
  y_full = jnp.concatenate(
      [y, jnp.zeros((rows, OUT_PAD - OUTPUT_DIM), jnp.float32)], axis=-1)
  o_ref[...] = y_full.reshape(b_blk, t_len, OUT_PAD).astype(o_ref.dtype)


def _pick_batch_block(batch, t_len, target_rows=2048, min_blocks=2):
  """Largest divisor of `batch` covering <= ~target_rows MXU rows per step,
  capped so the 'parallel' grid axis keeps >= min_blocks steps (v7x: 2 TCs)."""
  cap = max(1, target_rows // max(t_len, 1))
  if batch >= min_blocks:
    cap = min(cap, batch // min_blocks)
  best = 1
  for d in range(1, min(batch, cap) + 1):
    if batch % d == 0:
      best = d
  return best


def prepare_params(w1, b1, g1, be1, w2, b2, g2, be2):
  """One-time parameter packing (hoisted out of the per-call jit).

  Conv weights arrive in torch (O, I, K) layout; repack tap-major (K, I, O)
  in the MXU dtype, and pack biases / LayerNorm affine into one (6, C) f32
  operand (fewer DMAs / semaphores per call).
  """
  w1_t = jnp.transpose(w1, (2, 1, 0)).astype(MXU_DTYPE)  # (K, Cin, C1)
  w2_t = jnp.transpose(w2, (2, 1, 0)).astype(MXU_DTYPE)  # (K, C1,  C2)
  cp = max(INTER_DIM, OUTPUT_DIM)
  pad_c = lambda v: jnp.pad(v.astype(jnp.float32), (0, cp - v.shape[0]))
  params = jnp.stack([pad_c(b1), pad_c(g1), pad_c(be1),
                      pad_c(b2), pad_c(g2), pad_c(be2)])
  return w1_t, w2_t, params


@jax.jit
def temporal_block(x, w1_t, w2_t, params):
  """x: (B, T, INPUT_DIM) f32 -> (B, T, OUTPUT_DIM) f32."""
  B, Tlen, _ = x.shape
  x = x.astype(MXU_DTYPE)  # halve the dominant input DMA bytes

  b_blk = _pick_batch_block(B, Tlen)
  n_blocks = B // b_blk
  cp = max(INTER_DIM, OUTPUT_DIM)

  itemsize = jnp.dtype(MXU_DTYPE).itemsize
  cost = pl.CostEstimate(
      flops=2 * B * Tlen * KSIZE * (INPUT_DIM * INTER_DIM
                                    + INTER_DIM * OUTPUT_DIM),
      transcendentals=2 * B * Tlen,  # one rsqrt per LayerNorm row
      bytes_accessed=(itemsize * (x.size + w1_t.size + w2_t.size)
                      + 4 * params.size + 4 * B * Tlen * OUT_PAD),
  )

  grid_spec = pltpu.PrefetchScalarGridSpec(
      num_scalar_prefetch=0,
      grid=(n_blocks,),
      in_specs=[
          pl.BlockSpec((b_blk, Tlen, INPUT_DIM), lambda b: (b, 0, 0)),
          pl.BlockSpec((KSIZE, INPUT_DIM, INTER_DIM), lambda b: (0, 0, 0)),
          pl.BlockSpec((KSIZE, INTER_DIM, OUTPUT_DIM), lambda b: (0, 0, 0)),
          pl.BlockSpec((6, cp), lambda b: (0, 0)),
      ],
      out_specs=pl.BlockSpec((b_blk, Tlen, OUT_PAD), lambda b: (b, 0, 0)),
  )

  out = pl.pallas_call(
      temporal_block_kernel,
      out_shape=jax.ShapeDtypeStruct((B, Tlen, OUT_PAD), jnp.float32),
      grid_spec=grid_spec,
      compiler_params=pltpu.CompilerParams(
          dimension_semantics=("parallel",)),
      cost_estimate=cost,
  )(x, w1_t, w2_t, params)

  return out[..., :OUTPUT_DIM]


# ------------------------- pure-JAX reference ------------------------------
def reference_forward(x, w1, b1, g1, be1, w2, b2, g2, be2):
  """Mirrors the PyTorch forward exactly (NCW convs, chop right pad)."""
  xc = jnp.transpose(x, (0, 2, 1))  # (B, Cin, T)

  def conv(inp, w, b, pad, dil):
    out = lax.conv_general_dilated(
        inp, w, window_strides=(1,), padding=[(pad, pad)],
        rhs_dilation=(dil,), dimension_numbers=("NCH", "OIH", "NCH"))
    out = out + b[None, :, None]
    return out[:, :, :-pad]

  def layer_norm_c(inp, g, be):  # inp: (B, C, T), norm over C
    z = jnp.transpose(inp, (0, 2, 1))
    mu = jnp.mean(z, axis=-1, keepdims=True)
    var = jnp.mean(jnp.square(z - mu), axis=-1, keepdims=True)
    z = (z - mu) * lax.rsqrt(var + EPS) * g + be
    return jnp.transpose(z, (0, 2, 1))

  h = conv(xc, w1, b1, PAD1, D1)
  h = jnp.maximum(layer_norm_c(h, g1, be1), 0.0)
  h = conv(h, w2, b2, PAD2, D2)
  h = jnp.maximum(layer_norm_c(h, g2, be2), 0.0)
  return jnp.transpose(h, (0, 2, 1))


if __name__ == "__main__":
  key = jax.random.PRNGKey(0)
  ks = jax.random.split(key, 8)

  x = jax.random.normal(ks[0], (BATCH, T, INPUT_DIM), jnp.float32)

  # deterministic (He-like) parameter init; conv weights in torch layout (O, I, K)
  w1 = jax.random.normal(ks[1], (INTER_DIM, INPUT_DIM, KSIZE), jnp.float32) * (
      2.0 / (INPUT_DIM * KSIZE)) ** 0.5
  b1 = 0.01 * jax.random.normal(ks[2], (INTER_DIM,), jnp.float32)
  g1 = 1.0 + 0.05 * jax.random.normal(ks[3], (INTER_DIM,), jnp.float32)
  be1 = 0.05 * jax.random.normal(ks[4], (INTER_DIM,), jnp.float32)

  w2 = jax.random.normal(ks[5], (OUTPUT_DIM, INTER_DIM, KSIZE), jnp.float32) * (
      2.0 / (INTER_DIM * KSIZE)) ** 0.5
  b2 = 0.01 * jax.random.normal(ks[6], (OUTPUT_DIM,), jnp.float32)
  g2 = jnp.ones((OUTPUT_DIM,), jnp.float32)
  be2 = 0.02 * jax.random.normal(ks[7], (OUTPUT_DIM,), jnp.float32)

  # one-time packing, outside the per-call jit
  w1_t, w2_t, params = prepare_params(w1, b1, g1, be1, w2, b2, g2, be2)

  out = temporal_block(x, w1_t, w2_t, params)
  out = jax.block_until_ready(out)

  # The reference is the exact f32 mirror of the PyTorch forward; feed it the
  # same bf16-quantized x / conv weights the kernel's MXU actually consumes so
  # the comparison measures implementation error, not the expected bf16
  # quantization error (the remaining delta — the in-kernel bf16 cast of the
  # conv2 activations — is well under the tolerance below).
  q = lambda a: a.astype(MXU_DTYPE).astype(jnp.float32)
  ref = reference_forward(q(x), q(w1), b1, g1, be1, q(w2), b2, g2, be2)

  assert out.shape == (BATCH, T, OUTPUT_DIM), out.shape
  assert jnp.allclose(out, ref, atol=5e-2, rtol=5e-2), (
      float(jnp.max(jnp.abs(out - ref))))

  print("KERNEL_OK")
</pallas_src>

<mosaic_0001>
module attributes {stable_mosaic.version = 11 : i64} {
  func.func @temporal_block_kernel(%arg0: i32, %arg1: memref<1x16x19xbf16, #tpu.memory_space<vmem>>, %arg2: memref<3x19x15xbf16, #tpu.memory_space<vmem>>, %arg3: memref<3x15x15xbf16, #tpu.memory_space<vmem>>, %arg4: memref<6x15xf32, #tpu.memory_space<vmem>>, %arg5: memref<1x16x128xf32, #tpu.memory_space<vmem>>) attributes {dimension_semantics = [#tpu.dimension_semantics<parallel>], iteration_bounds = array<i64: 2>, scalar_prefetch = 0 : i64, scratch_operands = 0 : i64, tpu.core_type = #tpu.core_type<tc>, window_params = [{transform_indices = @transform_0, window_bounds = array<i64: 1, 16, 19>}, {pipeline_mode = #tpu.pipeline_mode<synchronous>, transform_indices = @transform_1, window_bounds = array<i64: 3, 19, 15>}, {pipeline_mode = #tpu.pipeline_mode<synchronous>, transform_indices = @transform_2, window_bounds = array<i64: 3, 15, 15>}, {pipeline_mode = #tpu.pipeline_mode<synchronous>, transform_indices = @transform_3, window_bounds = array<i64: 6, 15>}, {transform_indices = @transform_4, window_bounds = array<i64: 1, 16, 128>}]} {
    %c0 = arith.constant 0 : index
    %c0_0 = arith.constant 0 : index
    %0 = vector.load %arg4[%c0, %c0_0] : memref<6x15xf32, #tpu.memory_space<vmem>>, vector<6x15xf32>
    %1 = vector.extract_strided_slice %0 {offsets = [0, 0], sizes = [1, 15], strides = [1, 1]} : vector<6x15xf32> to vector<1x15xf32>
    %2 = vector.extract_strided_slice %0 {offsets = [1, 0], sizes = [1, 15], strides = [1, 1]} : vector<6x15xf32> to vector<1x15xf32>
    %3 = vector.extract_strided_slice %0 {offsets = [2, 0], sizes = [1, 15], strides = [1, 1]} : vector<6x15xf32> to vector<1x15xf32>
    %4 = vector.extract_strided_slice %0 {offsets = [3, 0], sizes = [1, 15], strides = [1, 1]} : vector<6x15xf32> to vector<1x15xf32>
    %5 = vector.extract_strided_slice %0 {offsets = [4, 0], sizes = [1, 15], strides = [1, 1]} : vector<6x15xf32> to vector<1x15xf32>
    %6 = vector.extract_strided_slice %0 {offsets = [5, 0], sizes = [1, 15], strides = [1, 1]} : vector<6x15xf32> to vector<1x15xf32>
    %7 = tpu.iota {dimensions = array<i32: 0>} : vector<16x1xi32>
    %c16_i32 = arith.constant 16 : i32
    %c0_i32 = arith.constant 0 : i32
    %8 = arith.cmpi eq, %c16_i32, %c0_i32 : i32
    %c1_i32 = arith.constant 1 : i32
    %9 = arith.select %8, %c1_i32, %c16_i32 : i32
    %10 = vector.broadcast %9 : i32 to vector<16x1xi32>
    %11 = arith.remsi %7, %10 : vector<16x1xi32>
    %c0_i32_1 = arith.constant 0 : i32
    %12 = vector.broadcast %c0_i32_1 : i32 to vector<16x1xi32>
    %13 = arith.cmpi ne, %11, %12 : vector<16x1xi32>
    %c0_i32_2 = arith.constant 0 : i32
    %14 = vector.broadcast %c0_i32_2 : i32 to vector<16x1xi32>
    %15 = arith.cmpi slt, %11, %14 : vector<16x1xi32>
    %c0_i32_3 = arith.constant 0 : i32
    %16 = arith.cmpi slt, %9, %c0_i32_3 : i32
    %17 = vector.broadcast %16 : i1 to vector<16x1xi1>
    %18 = vector.broadcast %17 : vector<16x1xi1> to vector<16x1xi1>
    %19 = arith.xori %15, %18 : vector<16x1xi1>
    %20 = arith.andi %19, %13 : vector<16x1xi1>
    %21 = vector.broadcast %9 : i32 to vector<16x1xi32>
    %22 = arith.addi %11, %21 : vector<16x1xi32>
    %23 = arith.select %20, %22, %11 : vector<16x1xi1>, vector<16x1xi32>
    %c0_4 = arith.constant 0 : index
    %c0_5 = arith.constant 0 : index
    %c0_6 = arith.constant 0 : index
    %24 = vector.load %arg1[%c0_4, %c0_5, %c0_6] : memref<1x16x19xbf16, #tpu.memory_space<vmem>>, vector<1x16x19xbf16>
    %25 = arith.extf %24 : vector<1x16x19xbf16> to vector<1x16x19xf32>
    %26 = vector.shape_cast %25 : vector<1x16x19xf32> to vector<16x19xf32>
    %cst = arith.constant 0.000000e+00 : f32
    %27 = vector.broadcast %cst : f32 to vector<16x15xf32>
    %c2_i32 = arith.constant 2 : i32
    %28 = tpu.dynamic_rotate %26 by %c2_i32 dim 0 : vector<16x19xf32>, i32 -> vector<16x19xf32>
    %c2_i32_7 = arith.constant 2 : i32
    %29 = vector.broadcast %c2_i32_7 : i32 to vector<16x1xi32>
    %30 = arith.cmpi sge, %23, %29 : vector<16x1xi32>
    %cst_8 = arith.constant 0.000000e+00 : f32
    %31 = vector.broadcast %cst_8 : f32 to vector<16x19xf32>
    %32 = vector.shape_cast %30 : vector<16x1xi1> to vector<16x1xi1>
    %33 = vector.broadcast %32 : vector<16x1xi1> to vector<16x19xi1>
    %34 = arith.select %33, %28, %31 : vector<16x19xi1>, vector<16x19xf32>
    %35 = arith.truncf %34 : vector<16x19xf32> to vector<16x19xbf16>
    %c0_9 = arith.constant 0 : index
    %c0_10 = arith.constant 0 : index
    %c0_11 = arith.constant 0 : index
    %36 = vector.load %arg2[%c0_9, %c0_10, %c0_11] : memref<3x19x15xbf16, #tpu.memory_space<vmem>>, vector<1x19x15xbf16>
    %37 = vector.shape_cast %36 : vector<1x19x15xbf16> to vector<19x15xbf16>
    %cst_12 = arith.constant dense<0.000000e+00> : vector<16x15xf32>
    %38 = tpu.matmul %35, %37, %cst_12 {dimension_numbers = #tpu.dot_dimension_numbers<[1], [0], [0], [1], [0, 0, 1, 1], [], []>} : vector<16x19xbf16>, vector<19x15xbf16>, vector<16x15xf32> -> vector<16x15xf32>
    %39 = arith.addf %27, %38 : vector<16x15xf32>
    %c1_i32_13 = arith.constant 1 : i32
    %40 = tpu.dynamic_rotate %26 by %c1_i32_13 dim 0 : vector<16x19xf32>, i32 -> vector<16x19xf32>
    %c1_i32_14 = arith.constant 1 : i32
    %41 = vector.broadcast %c1_i32_14 : i32 to vector<16x1xi32>
    %42 = arith.cmpi sge, %23, %41 : vector<16x1xi32>
    %cst_15 = arith.constant 0.000000e+00 : f32
    %43 = vector.broadcast %cst_15 : f32 to vector<16x19xf32>
    %44 = vector.shape_cast %42 : vector<16x1xi1> to vector<16x1xi1>
    %45 = vector.broadcast %44 : vector<16x1xi1> to vector<16x19xi1>
    %46 = arith.select %45, %40, %43 : vector<16x19xi1>, vector<16x19xf32>
    %47 = arith.truncf %46 : vector<16x19xf32> to vector<16x19xbf16>
    %c1 = arith.constant 1 : index
    %c0_16 = arith.constant 0 : index
    %c0_17 = arith.constant 0 : index
    %48 = vector.load %arg2[%c1, %c0_16, %c0_17] : memref<3x19x15xbf16, #tpu.memory_space<vmem>>, vector<1x19x15xbf16>
    %49 = vector.shape_cast %48 : vector<1x19x15xbf16> to vector<19x15xbf16>
    %cst_18 = arith.constant dense<0.000000e+00> : vector<16x15xf32>
    %50 = tpu.matmul %47, %49, %cst_18 {dimension_numbers = #tpu.dot_dimension_numbers<[1], [0], [0], [1], [0, 0, 1, 1], [], []>} : vector<16x19xbf16>, vector<19x15xbf16>, vector<16x15xf32> -> vector<16x15xf32>
    %51 = arith.addf %39, %50 : vector<16x15xf32>
    %52 = arith.truncf %26 : vector<16x19xf32> to vector<16x19xbf16>
    %c2 = arith.constant 2 : index
    %c0_19 = arith.constant 0 : index
    %c0_20 = arith.constant 0 : index
    %53 = vector.load %arg2[%c2, %c0_19, %c0_20] : memref<3x19x15xbf16, #tpu.memory_space<vmem>>, vector<1x19x15xbf16>
    %54 = vector.shape_cast %53 : vector<1x19x15xbf16> to vector<19x15xbf16>
    %cst_21 = arith.constant dense<0.000000e+00> : vector<16x15xf32>
    %55 = tpu.matmul %52, %54, %cst_21 {dimension_numbers = #tpu.dot_dimension_numbers<[1], [0], [0], [1], [0, 0, 1, 1], [], []>} : vector<16x19xbf16>, vector<19x15xbf16>, vector<16x15xf32> -> vector<16x15xf32>
    %56 = arith.addf %51, %55 : vector<16x15xf32>
    %57 = vector.broadcast %1 : vector<1x15xf32> to vector<16x15xf32>
    %58 = arith.addf %56, %57 : vector<16x15xf32>
    %cst_22 = arith.constant dense<0.000000e+00> : vector<16xf32>
    %59 = vector.multi_reduction <add>, %58, %cst_22 [1] : vector<16x15xf32> to vector<16xf32>
    %60 = vector.shape_cast %59 : vector<16xf32> to vector<16x1xf32>
    %cst_23 = arith.constant 1.500000e+01 : f32
    %61 = vector.broadcast %cst_23 : f32 to vector<16x1xf32>
    %62 = arith.divf %60, %61 : vector<16x1xf32>
    %63 = vector.broadcast %62 : vector<16x1xf32> to vector<16x15xf32>
    %64 = arith.subf %58, %63 : vector<16x15xf32>
    %65 = arith.mulf %64, %64 : vector<16x15xf32>
    %cst_24 = arith.constant dense<0.000000e+00> : vector<16xf32>
    %66 = vector.multi_reduction <add>, %65, %cst_24 [1] : vector<16x15xf32> to vector<16xf32>
    %67 = vector.shape_cast %66 : vector<16xf32> to vector<16x1xf32>
    %cst_25 = arith.constant 1.500000e+01 : f32
    %68 = vector.broadcast %cst_25 : f32 to vector<16x1xf32>
    %69 = arith.divf %67, %68 : vector<16x1xf32>
    %70 = vector.broadcast %62 : vector<16x1xf32> to vector<16x15xf32>
    %71 = arith.subf %58, %70 : vector<16x15xf32>
    %cst_26 = arith.constant 9.99999974E-6 : f32
    %72 = vector.broadcast %cst_26 : f32 to vector<16x1xf32>
    %73 = arith.addf %69, %72 : vector<16x1xf32>
    %74 = math.rsqrt %73 : vector<16x1xf32>
    %75 = vector.broadcast %74 : vector<16x1xf32> to vector<16x15xf32>
    %76 = arith.mulf %71, %75 : vector<16x15xf32>
    %77 = vector.broadcast %2 : vector<1x15xf32> to vector<16x15xf32>
    %78 = arith.mulf %76, %77 : vector<16x15xf32>
    %79 = vector.broadcast %3 : vector<1x15xf32> to vector<16x15xf32>
    %80 = arith.addf %78, %79 : vector<16x15xf32>
    %cst_27 = arith.constant 0.000000e+00 : f32
    %81 = vector.broadcast %cst_27 : f32 to vector<16x15xf32>
    %82 = arith.maximumf %80, %81 : vector<16x15xf32>
    %cst_28 = arith.constant 0.000000e+00 : f32
    %83 = vector.broadcast %cst_28 : f32 to vector<16x15xf32>
    %c4_i32 = arith.constant 4 : i32
    %84 = tpu.dynamic_rotate %82 by %c4_i32 dim 0 : vector<16x15xf32>, i32 -> vector<16x15xf32>
    %c4_i32_29 = arith.constant 4 : i32
    %85 = vector.broadcast %c4_i32_29 : i32 to vector<16x1xi32>
    %86 = arith.cmpi sge, %23, %85 : vector<16x1xi32>
    %cst_30 = arith.constant 0.000000e+00 : f32
    %87 = vector.broadcast %cst_30 : f32 to vector<16x15xf32>
    %88 = vector.shape_cast %86 : vector<16x1xi1> to vector<16x1xi1>
    %89 = vector.broadcast %88 : vector<16x1xi1> to vector<16x15xi1>
    %90 = arith.select %89, %84, %87 : vector<16x15xi1>, vector<16x15xf32>
    %91 = arith.truncf %90 : vector<16x15xf32> to vector<16x15xbf16>
    %c0_31 = arith.constant 0 : index
    %c0_32 = arith.constant 0 : index
    %c0_33 = arith.constant 0 : index
    %92 = vector.load %arg3[%c0_31, %c0_32, %c0_33] : memref<3x15x15xbf16, #tpu.memory_space<vmem>>, vector<1x15x15xbf16>
    %93 = vector.shape_cast %92 : vector<1x15x15xbf16> to vector<15x15xbf16>
    %cst_34 = arith.constant dense<0.000000e+00> : vector<16x15xf32>
    %94 = tpu.matmul %91, %93, %cst_34 {dimension_numbers = #tpu.dot_dimension_numbers<[1], [0], [0], [1], [0, 0, 1, 1], [], []>} : vector<16x15xbf16>, vector<15x15xbf16>, vector<16x15xf32> -> vector<16x15xf32>
    %95 = arith.addf %83, %94 : vector<16x15xf32>
    %c2_i32_35 = arith.constant 2 : i32
    %96 = tpu.dynamic_rotate %82 by %c2_i32_35 dim 0 : vector<16x15xf32>, i32 -> vector<16x15xf32>
    %c2_i32_36 = arith.constant 2 : i32
    %97 = vector.broadcast %c2_i32_36 : i32 to vector<16x1xi32>
    %98 = arith.cmpi sge, %23, %97 : vector<16x1xi32>
    %cst_37 = arith.constant 0.000000e+00 : f32
    %99 = vector.broadcast %cst_37 : f32 to vector<16x15xf32>
    %100 = vector.shape_cast %98 : vector<16x1xi1> to vector<16x1xi1>
    %101 = vector.broadcast %100 : vector<16x1xi1> to vector<16x15xi1>
    %102 = arith.select %101, %96, %99 : vector<16x15xi1>, vector<16x15xf32>
    %103 = arith.truncf %102 : vector<16x15xf32> to vector<16x15xbf16>
    %c1_38 = arith.constant 1 : index
    %c0_39 = arith.constant 0 : index
    %c0_40 = arith.constant 0 : index
    %104 = vector.load %arg3[%c1_38, %c0_39, %c0_40] : memref<3x15x15xbf16, #tpu.memory_space<vmem>>, vector<1x15x15xbf16>
    %105 = vector.shape_cast %104 : vector<1x15x15xbf16> to vector<15x15xbf16>
    %cst_41 = arith.constant dense<0.000000e+00> : vector<16x15xf32>
    %106 = tpu.matmul %103, %105, %cst_41 {dimension_numbers = #tpu.dot_dimension_numbers<[1], [0], [0], [1], [0, 0, 1, 1], [], []>} : vector<16x15xbf16>, vector<15x15xbf16>, vector<16x15xf32> -> vector<16x15xf32>
    %107 = arith.addf %95, %106 : vector<16x15xf32>
    %108 = arith.truncf %82 : vector<16x15xf32> to vector<16x15xbf16>
    %c2_42 = arith.constant 2 : index
    %c0_43 = arith.constant 0 : index
    %c0_44 = arith.constant 0 : index
    %109 = vector.load %arg3[%c2_42, %c0_43, %c0_44] : memref<3x15x15xbf16, #tpu.memory_space<vmem>>, vector<1x15x15xbf16>
    %110 = vector.shape_cast %109 : vector<1x15x15xbf16> to vector<15x15xbf16>
    %cst_45 = arith.constant dense<0.000000e+00> : vector<16x15xf32>
    %111 = tpu.matmul %108, %110, %cst_45 {dimension_numbers = #tpu.dot_dimension_numbers<[1], [0], [0], [1], [0, 0, 1, 1], [], []>} : vector<16x15xbf16>, vector<15x15xbf16>, vector<16x15xf32> -> vector<16x15xf32>
    %112 = arith.addf %107, %111 : vector<16x15xf32>
    %113 = vector.broadcast %4 : vector<1x15xf32> to vector<16x15xf32>
    %114 = arith.addf %112, %113 : vector<16x15xf32>
    %cst_46 = arith.constant dense<0.000000e+00> : vector<16xf32>
    %115 = vector.multi_reduction <add>, %114, %cst_46 [1] : vector<16x15xf32> to vector<16xf32>
    %116 = vector.shape_cast %115 : vector<16xf32> to vector<16x1xf32>
    %cst_47 = arith.constant 1.500000e+01 : f32
    %117 = vector.broadcast %cst_47 : f32 to vector<16x1xf32>
    %118 = arith.divf %116, %117 : vector<16x1xf32>
    %119 = vector.broadcast %118 : vector<16x1xf32> to vector<16x15xf32>
    %120 = arith.subf %114, %119 : vector<16x15xf32>
    %121 = arith.mulf %120, %120 : vector<16x15xf32>
    %cst_48 = arith.constant dense<0.000000e+00> : vector<16xf32>
    %122 = vector.multi_reduction <add>, %121, %cst_48 [1] : vector<16x15xf32> to vector<16xf32>
    %123 = vector.shape_cast %122 : vector<16xf32> to vector<16x1xf32>
    %cst_49 = arith.constant 1.500000e+01 : f32
    %124 = vector.broadcast %cst_49 : f32 to vector<16x1xf32>
    %125 = arith.divf %123, %124 : vector<16x1xf32>
    %126 = vector.broadcast %118 : vector<16x1xf32> to vector<16x15xf32>
    %127 = arith.subf %114, %126 : vector<16x15xf32>
    %cst_50 = arith.constant 9.99999974E-6 : f32
    %128 = vector.broadcast %cst_50 : f32 to vector<16x1xf32>
    %129 = arith.addf %125, %128 : vector<16x1xf32>
    %130 = math.rsqrt %129 : vector<16x1xf32>
    %131 = vector.broadcast %130 : vector<16x1xf32> to vector<16x15xf32>
    %132 = arith.mulf %127, %131 : vector<16x15xf32>
    %133 = vector.broadcast %5 : vector<1x15xf32> to vector<16x15xf32>
    %134 = arith.mulf %132, %133 : vector<16x15xf32>
    %135 = vector.broadcast %6 : vector<1x15xf32> to vector<16x15xf32>
    %136 = arith.addf %134, %135 : vector<16x15xf32>
    %cst_51 = arith.constant 0.000000e+00 : f32
    %137 = vector.broadcast %cst_51 : f32 to vector<16x15xf32>
    %138 = arith.maximumf %136, %137 : vector<16x15xf32>
    %cst_52 = arith.constant 0.000000e+00 : f32
    %139 = vector.broadcast %cst_52 : f32 to vector<16x113xf32>
    %140 = tpu.concatenate %138, %139 in 1 : vector<16x15xf32>, vector<16x113xf32> -> vector<16x128xf32>
    %141 = vector.shape_cast %140 : vector<16x128xf32> to vector<1x16x128xf32>
    %c0_53 = arith.constant 0 : index
    %c0_54 = arith.constant 0 : index
    %c0_55 = arith.constant 0 : index
    %142 = vector.load %arg5[%c0_53, %c0_54, %c0_55] : memref<1x16x128xf32, #tpu.memory_space<vmem>>, vector<1x16x128xf32>
    tpu.vector_store %arg5[%c0_53, %c0_54, %c0_55], %141 {strides = array<i32>} : memref<1x16x128xf32, #tpu.memory_space<vmem>>, vector<1x16x128xf32>,
    return
  }
  func.func @transform_0(%arg0: i32) -> (i32, i32, i32) {
    %c0_i32 = arith.constant 0 : i32
    %c0_i32_0 = arith.constant 0 : i32
    %c0_i32_1 = arith.constant 0 : i32
    return %arg0, %c0_i32, %c0_i32_0 : i32, i32, i32
  }
  func.func @transform_1(%arg0: i32) -> (i32, i32, i32) {
    %c0_i32 = arith.constant 0 : i32
    %c0_i32_0 = arith.constant 0 : i32
    %c0_i32_1 = arith.constant 0 : i32
    %c0_i32_2 = arith.constant 0 : i32
    return %c0_i32, %c0_i32_0, %c0_i32_1 : i32, i32, i32
  }
  func.func @transform_2(%arg0: i32) -> (i32, i32, i32) {
    %c0_i32 = arith.constant 0 : i32
    %c0_i32_0 = arith.constant 0 : i32
    %c0_i32_1 = arith.constant 0 : i32
    %c0_i32_2 = arith.constant 0 : i32
    return %c0_i32, %c0_i32_0, %c0_i32_1 : i32, i32, i32
  }
  func.func @transform_3(%arg0: i32) -> (i32, i32) {
    %c0_i32 = arith.constant 0 : i32
    %c0_i32_0 = arith.constant 0 : i32
    %c0_i32_1 = arith.constant 0 : i32
    return %c0_i32, %c0_i32_0 : i32, i32
  }
  func.func @transform_4(%arg0: i32) -> (i32, i32, i32) {
    %c0_i32 = arith.constant 0 : i32
    %c0_i32_0 = arith.constant 0 : i32
    %c0_i32_1 = arith.constant 0 : i32
    return %arg0, %c0_i32, %c0_i32_0 : i32, i32, i32
  }
}

</mosaic_0001>

<bundles_post_ra>
// kernel: temporal_block.1
= control target key start
LH: loop header
LB: loop body
LE: loop exit
PB: predicated region body
PF: predicated region fallthrough
CT: control target
= control target key end

     0   :  { %s953_s15 = smov 0   ;;  %s1077_s0 = inlined_call_operand.vmem [shape: bf16[2,16,19], index: 0, kind: input, shape index: {}]   ;;  %s1078_s1 = inlined_call_operand.vmem [shape: bf16[3,19,15], index: 1, kind: input, shape index: {}]   ;;  %s1079_s2 = inlined_call_operand.vmem [shape: bf16[3,15,15], index: 2, kind: input, shape index: {}]   ;;  %s1080_s3 = inlined_call_operand.vmem [shape: f32[6,15], index: 3, kind: input, shape index: {}]   ;;  %s1081_s4 = inlined_call_operand.vmem [shape: f32[2,16,128], index: 4, kind: output, shape index: {}]  }
   0x1 LB: > { %s791_s16 = sadd.s32 4294967295, %s923_s15   ;;  %p795_p0 = scmp.ge.s32.totalorder %s923_s15, 1  ;;  %s923_s15 = sphi %s953_s15, %s14_s15  }
   0x2   : > { %p162_p1 = scmp.lt.s32.totalorder %s923_s15, 3 }
   0x4   : > { %p163_p2 = pnand %p795_p0, %p162_p1 }
   0x5   : > { %p188_p3 = scmp.lt.s32.totalorder (!%p163_p2), %s791_s16, 1 }
   0x6   : > { %166 = sbr.rel (%p163_p2) target bundleno = 1071 (0x42f), region = 36 }
   0xb   : > { %v898_v0 = vld [vmem:[%s1078_s1 + $0x14] ss:$0 sps:$4 sm:$0x33]   ;;  %v925_v1 = vmov 0.0   ;;  %vm279_vm0 = vcmask 1040384   ;;  %vm280_vm1 = vcmask 1041408   ;;  %v200_v4 = vlaneseq }
   0xc   : > { %845 = vmatprep.subr.bf16.mxu0 %v925_v1  ;;  %853 = vmatprep.subr.bf16.mxu1 %v925_v1  ;;  %v926_v2 = vmov 65535   ;;  %v900_v7 = vld [vmem:[%s1078_s1 + $0x8] ss:$0 sps:$4 sm:$0x33]   ;;  %v901_v9 = vld [vmem:[%s1078_s1 + $0xc] sm:$0xff]   ;;  %vm927_vm2 = vmmov 0  }
   0xd   : > { %v281_v3 = vsel %vm279_vm0, 4294967295, %v926_v2  ;;  %849 = vmatprep.mubr.msk.bf16.mxu0 %vm927_vm2, %v925_v1  ;;  %v975_v10 = vshrl.u32 %v200_v4, 7  ;;  %857 = vmatprep.mubr.msk.bf16.mxu1 %vm927_vm2, %v925_v1  ;;  %v902_v11 = vld [vmem:[%s1078_s1] sm:$0xff]   ;;  %s1083_s16 = smov (!%p188_p3, %s791_s16), 1  ;;  %vm275_vm7 = vcmask 154624   ;;  %v903_v30 = vld [vmem:[%s1078_s1 + $0x18] sm:$0xff]  }
   0xe   : > { %v282_v5 = vsel %vm280_vm1, %v281_v3, 0  ;;  %s828_s25 = sshll.u32 %s1083_s16, 3  ;;  %v899_v14 = vld [vmem:[%s1078_s1 + $0x20] ss:$0 sps:$4 sm:$0x33]   ;;  %vm452_vm8 = vcmask 121856  }
   0xf   : > { %v284_v6 = vand.u32 %v898_v0, %v282_v5  ;;  %v340_v8 = vand.u32 %v900_v7, %v282_v5  ;;  %v988_v12 = vand.u32 15, %v975_v10  ;;  %s192_s28 = scalar_lea.vmem %s1077_s0, %s828_s25  ;;  %vm250_vm3 = vcmp.lt.s32.totalorder %v975_v10, 1  ;;  %v1023_v38 = vld [vmem:[%s1080_s3] sm:$0x3f]  ;;  %v905_v4 = vld [vmem:[%s1079_s2 + $0x8] sm:$0xff]   ;;  %s829_s17 = sshll.u32 %s1083_s16, 4 }
  0x10   : > { %v227_v13 = vld [vmem:[%s192_s28] sm:$0xff]   ;;  %vm233_vm5 = vcmp.lt.s32.totalorder %v975_v10, 2  ;;  %v401_v25 = vand.u32 %v899_v14, %v282_v5  ;;  %v448_v35 = vsub.s32 0, %v975_v10  ;;  %vm528_vm9 = vcmask 1046528   ;;  %s197_s20 = scalar_lea.vmem %s1081_s4, %s829_s17 }
  0x11   : > { %846 = vmatpush3.bf16.msra.mxu0 %v284_v6  ;;  %854 = vmatpush3.bf16.msra.mxu1 %v340_v8  ;;  %v229_v15 = vunpack.c.l.bf16 %v227_v13  ;;  %v230_v16 = vunpack.c.h.bf16 %v227_v13  ;;  %vm253_vm4 = vcmp.ge.s32.totalorder %v988_v12, 1  ;;  %vm236_vm6 = vcmp.ge.s32.totalorder %v988_v12, 2  ;;  %v906_v5 = vld [vmem:[%s1079_s2] sm:$0xff]  }
  0x12   : > { %847 = vmatprep.subr.bf16.mxu0 %v925_v1  ;;  %855 = vmatprep.subr.bf16.mxu1 %v925_v1  ;;  %v449_v42 = vrot.slane %v1023_v38, %v448_v35  ;;  %vm529_vm10 = vcmask 1047552   ;;  %v530_v0 = vsel %vm528_vm9, 4294967295, %v926_v2  ;;  %vm496_vm11 = vcmp.lt.s32.totalorder %v975_v10, 4 }
  0x13   : > { %v248_v17 = vrot.slane %v229_v15, 7  ;;  %v249_v18 = vrot.slane %v230_v16, 7  ;;  %v231_v19 = vrot.slane %v229_v15, 6  ;;  %v232_v20 = vrot.slane %v230_v16, 6 }
  0x14   : > { %v531_v3 = vsel %vm529_vm10, %v530_v0, 0  ;;  %v482_v15 = vsub.s32 1, %v975_v10  ;;  %v488_v16 = vsub.s32 2, %v975_v10  ;;  %vm499_vm12 = vcmp.ge.s32.totalorder %v988_v12, 4 }
  0x15   : > { %848 = vmatpush3.bf16.msra.mxu0 %v901_v9  ;;  %856 = vmatpush3.bf16.msra.mxu1 %v902_v11  ;;  %v251_v21 = vsel %vm250_vm3, %v248_v17, %v249_v18  ;;  %v252_v22 = vsel %vm250_vm3, %v249_v18, %v248_v17  ;;  %v234_v23 = vsel %vm233_vm5, %v231_v19, %v232_v20 }
  0x16   : > { %861 = vmatprep.subr.bf16.mxu0 %v925_v1  ;;  %869 = vmatprep.subr.bf16.mxu1 %v925_v1  ;;  %v235_v24 = vsel %vm233_vm5, %v232_v20, %v231_v19  ;;  %v259_v26 = vsel %vm253_vm4, %v252_v22, 0.0  ;;  %v533_v6 = vand.u32 %v905_v4, %v531_v3  ;;  %v585_v7 = vand.u32 %v906_v5, %v531_v3 }
  0x17   : > { %v242_v27 = vsel %vm236_vm6, %v235_v24, 0.0  ;;  %v261_v28 = vpack.c.bf16 %v251_v21, %v259_v26  ;;  %v483_v17 = vrot.slane %v1023_v38, %v482_v15  ;;  %v489_v19 = vrot.slane %v1023_v38, %v488_v16 }
  0x18   : > { %v244_v29 = vpack.c.bf16 %v234_v23, %v242_v27 }
  0x19   : > { %850 = vmatmul.mubr.msk.bf16.vlgmr.msra.gmra.mxu0 %vm275_vm7, %v261_v28 }
  0x1a   : > { %858 = vmatmul.mubr.msk.bf16.vlgmr.msra.gmra.mxu1 %vm275_vm7, %v244_v29  ;;  %862 = vmatpush3.bf16.msra.mxu0 %v401_v25  ;;  %v907_v29 = vld [vmem:[%s1079_s2 + $0x10] sm:$0xff]  }
  0x1b   : > { %865 = vmatprep.mubr.msk.bf16.mxu0 %vm927_vm2, %v925_v1  ;;  %863 = vmatprep.subr.bf16.mxu0 %v925_v1 }
  0x1c   : > { %871 = vmatprep.mubr.msk.bf16.mxu1 %vm927_vm2, %v925_v1  ;;  %870 = vmatpush3.bf16.msra.mxu1 %v533_v6 }
  0x1d   : > { %881 = vmatprep.subr.bf16.mxu1 %v925_v1 }
  0x1e   : > { %864 = vmatpush3.bf16.msra.mxu0 %v903_v30 }
  0x1f   : > { %875 = vmatprep.subr.bf16.mxu0 %v925_v1 }
  0x21   : > { %866 = vmatmul.mubr.msk.bf16.vlgmr.msra.gmra.mxu0 %vm275_vm7, %v227_v13 }
  0x22   : > { %877 = vmatprep.mubr.msk.bf16.mxu0 %vm927_vm2, %v925_v1  ;;  %876 = vmatpush3.bf16.msra.mxu0 %v585_v7 }
  0xd9   : > { %v320_v31 = vpop.f32.mrf.mxu0 }
  0xda   : > { %v376_v32 = vpop.f32.mrf.mxu1 }
  0xdb   : > { %v851_v33 = vpop.f32.mrf.mxu0  ;;  %v377_v41 = vadd.f32 %v376_v32, %v320_v31 }
  0xdc   : > { %v859_v34 = vpop.f32.mrf.mxu1 }
  0xdd   : > { %v323_v36 = vpop.f32.mrf.mxu0 }
  0xde   : > { %v379_v37 = vpop.f32.mrf.mxu1 }
  0xdf   : > { %v852_v39 = vpop.f32.mrf.mxu0  ;;  %v380_v46 = vadd.f32 %v379_v37, %v323_v36 }
  0xe0   : > { %v860_v40 = vpop.f32.mrf.mxu1 }
  0xe1   : > { %v437_v43 = vpop.f32.mrf.mxu0 }
  0xe2   : > { %v444_v44 = vadd.f32 %v437_v43, %v377_v41  ;;  %v641_v41 = vand.u32 %v907_v29, %v531_v3 }
  0xe3   : > { %v867_v45 = vpop.f32.mrf.mxu0 }
  0xe4   : > { %v450_v47 = vadd.f32 %v449_v42, %v444_v44 }
  0xe5   : > { %v440_v48 = vpop.f32.mrf.mxu0 }
  0xe6   : > { %v445_v49 = vadd.f32 %v440_v48, %v380_v46  ;;  %v453_v50 = vsel %vm452_vm8, %v450_v47, 0.0  ;;  %v688_v48 = vsub.s32 3, %v975_v10 }
  0xe7   : > { %v868_v51 = vpop.f32.mrf.mxu0  ;;  %454 = vadd.xlane.f32.xlu0 %v453_v50 }
  0xe8   : > { %v451_v52 = vadd.f32 %v449_v42, %v445_v49 }
  0xea   : > { %v456_v53 = vsel %vm452_vm8, %v451_v52, 0.0 }
  0xeb   : > { %457 = vadd.xlane.f32.xlu0 %v456_v53 }
 0x170   : > { %v455_v54 = vpop.xlane.xlu0 %454 }
 0x171   : > { %v460_v55 = vmul.f32 0.06666667, %v455_v54  ;;  %v689_v54 = vrot.slane %v1023_v38, %v688_v48 }
 0x173   : > { %v462_v56 = vsub.f32 %v450_v47, %v460_v55 }
 0x174   : > { %v458_v57 = vpop.xlane.xlu0 %457 }
 0x175   : > { %v461_v58 = vmul.f32 0.06666667, %v458_v57  ;;  %v464_v59 = vmul.f32 %v462_v56, %v462_v56 }
 0x177   : > { %v463_v60 = vsub.f32 %v451_v52, %v461_v58  ;;  %v466_v61 = vsel %vm452_vm8, %v464_v59, 0.0 }
 0x178   : > { %467 = vadd.xlane.f32.xlu1 %v466_v61 }
 0x179   : > { %v465_v62 = vmul.f32 %v463_v60, %v463_v60 }
 0x17b   : > { %v469_v63 = vsel %vm452_vm8, %v465_v62, 0.0 }
 0x17c   : > { %470 = vadd.xlane.f32.xlu1 %v469_v63 }
 0x201   : > { %v468_v8 = vpop.xlane.xlu1 %467 }
 0x202   : > { %v472_v9 = vmul.f32 0.06666667, %v468_v8 }
 0x204   : > { %v474_v11 = vadd.f32 1e-05, %v472_v9 }
 0x205   : > { %v471_v13 = vpop.xlane.xlu1 %470 }
 0x206   : > { %909 = vrsqrt.f32 %v474_v11  ;;  %v473_v2 = vmul.f32 0.06666667, %v471_v13 }
 0x208   : > { %v475_v14 = vadd.f32 1e-05, %v473_v2 }
 0x20a   : > { %911 = vrsqrt.f32 %v475_v14 }
 0x213   : > { %v910_v18 = vpop.eup %909 }
 0x214   : > { %v478_v20 = vmul.f32 %v910_v18, %v462_v56 }
 0x216   : > { %v484_v21 = vmul.f32 %v483_v17, %v478_v20  ;;  %v720_v20 = vsub.s32 4, %v975_v10 }
 0x217   : > { %v912_v22 = vpop.eup %911 }
 0x218   : > { %v490_v23 = vadd.f32 %v489_v19, %v484_v21  ;;  %v479_v24 = vmul.f32 %v912_v22, %v463_v60  ;;  %v726_v21 = vsub.s32 5, %v975_v10  ;;  %v721_v22 = vrot.slane %v1023_v38, %v720_v20 }
 0x21a   : > { %v485_v25 = vmul.f32 %v483_v17, %v479_v24  ;;  %v492_v26 = vmax.f32 %v490_v23, 0.0  ;;  %v727_v24 = vrot.slane %v1023_v38, %v726_v21 }
 0x21c   : > { %v491_v27 = vadd.f32 %v489_v19, %v485_v25  ;;  %v510_v30 = vrot.slane %v492_v26, 6  ;;  %v494_v32 = vrot.slane %v492_v26, 4 }
 0x21e   : > { %v493_v28 = vmax.f32 %v491_v27, 0.0 }
 0x220   : > { %v511_v31 = vrot.slane %v493_v28, 6  ;;  %v495_v33 = vrot.slane %v493_v28, 4  ;;  %v628_v44 = vpack.c.bf16 %v493_v28, %v492_v26 }
 0x222   : > { %v512_v34 = vsel %vm233_vm5, %v510_v30, %v511_v31  ;;  %v513_v35 = vsel %vm233_vm5, %v511_v31, %v510_v30  ;;  %v497_v36 = vsel %vm496_vm11, %v494_v32, %v495_v33  ;;  %v498_v37 = vsel %vm496_vm11, %v495_v33, %v494_v32 }
 0x223   : > { %v514_v39 = vsel %vm236_vm6, %v513_v35, 0.0  ;;  %v505_v40 = vsel %vm499_vm12, %v498_v37, 0.0 }
 0x224   : > { %v516_v42 = vpack.c.bf16 %v512_v34, %v514_v39  ;;  %v507_v43 = vpack.c.bf16 %v497_v36, %v505_v40 }
 0x226   : > { %872 = vmatmul.mubr.msk.bf16.vlgmr.msra.gmra.mxu1 %vm452_vm8, %v516_v42  ;;  %878 = vmatmul.mubr.msk.bf16.vlgmr.msra.gmra.mxu0 %vm452_vm8, %v507_v43 }
 0x227   : > { %882 = vmatpush3.bf16.msra.mxu1 %v641_v41  ;;  %883 = vmatprep.mubr.msk.bf16.mxu1 %vm927_vm2, %v925_v1 }
 0x22e   : > { %884 = vmatmul.mubr.msk.bf16.vlgmr.msra.gmra.mxu1 %vm452_vm8, %v628_v44 }
 0x2e6   : > { %v569_v45 = vpop.f32.mrf.mxu1  ;;  %v621_v46 = vpop.f32.mrf.mxu0 }
 0x2e7   : > { %v622_v53 = vadd.f32 %v621_v46, %v569_v45 }
 0x2e8   : > { %v873_v47 = vpop.f32.mrf.mxu1  ;;  %v879_v12 = vpop.f32.mrf.mxu0 }
 0x2ea   : > { %v572_v49 = vpop.f32.mrf.mxu1  ;;  %v624_v50 = vpop.f32.mrf.mxu0 }
 0x2eb   : > { %v625_v1 = vadd.f32 %v624_v50, %v572_v49 }
 0x2ec   : > { %v874_v51 = vpop.f32.mrf.mxu1  ;;  %v880_v52 = vpop.f32.mrf.mxu0 }
 0x2ee   : > { %v677_v55 = vpop.f32.mrf.mxu1 }
 0x2ef   : > { %v684_v56 = vadd.f32 %v677_v55, %v622_v53 }
 0x2f0   : > { %v885_v57 = vpop.f32.mrf.mxu1 }
 0x2f1   : > { %v690_v58 = vadd.f32 %v689_v54, %v684_v56 }
 0x2f2   : > { %v680_v59 = vpop.f32.mrf.mxu1 }
 0x2f3   : > { %v685_v60 = vadd.f32 %v680_v59, %v625_v1  ;;  %v692_v61 = vsel %vm452_vm8, %v690_v58, 0.0 }
 0x2f4   : > { %693 = vadd.xlane.f32.xlu0 %v692_v61  ;;  %v886_v62 = vpop.f32.mrf.mxu1 }
 0x2f5   : > { %v691_v63 = vadd.f32 %v689_v54, %v685_v60 }
 0x2f7   : > { %v695_v0 = vsel %vm452_vm8, %v691_v63, 0.0 }
 0x2f8   : > { %696 = vadd.xlane.f32.xlu1 %v695_v0 }
 0x37d   : > { %v694_v3 = vpop.xlane.xlu0 %693 }
 0x37e   : > { %v698_v4 = vmul.f32 0.06666667, %v694_v3 }
 0x380   : > { %v700_v5 = vsub.f32 %v690_v58, %v698_v4 }
 0x381   : > { %v697_v6 = vpop.xlane.xlu1 %696 }
 0x382   : > { %v699_v7 = vmul.f32 0.06666667, %v697_v6  ;;  %v702_v8 = vmul.f32 %v700_v5, %v700_v5 }
 0x384   : > { %v701_v9 = vsub.f32 %v691_v63, %v699_v7  ;;  %v704_v11 = vsel %vm452_vm8, %v702_v8, 0.0 }
 0x385   : > { %705 = vadd.xlane.f32.xlu0 %v704_v11 }
 0x386   : > { %v703_v13 = vmul.f32 %v701_v9, %v701_v9 }
 0x388   : > { %v707_v2 = vsel %vm452_vm8, %v703_v13, 0.0 }
 0x389   : > { %708 = vadd.xlane.f32.xlu1 %v707_v2 }
 0x40e   : > { %v706_v14 = vpop.xlane.xlu0 %705 }
 0x40f   : > { %v710_v15 = vmul.f32 0.06666667, %v706_v14 }
 0x411   : > { %v712_v16 = vadd.f32 1e-05, %v710_v15 }
 0x412   : > { %v709_v17 = vpop.xlane.xlu1 %708 }
 0x413   : > { %913 = vrsqrt.f32 %v712_v16  ;;  %v711_v18 = vmul.f32 0.06666667, %v709_v17 }
 0x415   : > { %v713_v19 = vadd.f32 1e-05, %v711_v18 }
 0x417   : > { %915 = vrsqrt.f32 %v713_v19 }
 0x420   : > { %v914_v23 = vpop.eup %913 }
 0x421   : > { %v716_v25 = vmul.f32 %v914_v23, %v700_v5 }
 0x423   : > { %v722_v26 = vmul.f32 %v721_v22, %v716_v25 }
 0x424   : > { %v916_v27 = vpop.eup %915 }
 0x425   : > { %v728_v28 = vadd.f32 %v727_v24, %v722_v26  ;;  %v717_v29 = vmul.f32 %v916_v27, %v701_v9 }
 0x427   : > { %v730_v30 = vmax.f32 %v728_v28, 0.0  ;;  %v723_v31 = vmul.f32 %v721_v22, %v717_v29 }
 0x429   : > { %v732_v32 = vsel %vm452_vm8, %v730_v30, 0.0  ;;  %v729_v10 = vadd.f32 %v727_v24, %v723_v31 }
 0x42a   : > { %734 = vst [vmem:[%s197_s20] sm:$0xff] %v732_v32 }
 0x42b   : > { %v731_v33 = vmax.f32 %v729_v10, 0.0 }
 0x42d   : > { %v733_v34 = vsel %vm452_vm8, %v731_v33, 0.0 }
 0x42e   : > { %735 = vst [vmem:[%s197_s20 + $0x8] sm:$0xff] %v733_v34 }
 0x42f PF: > { %s14_s15 = sadd.s32 1, %s923_s15  }
 0x430   : > { %p11_p4 = scmp.ge.s32.totalorder %s14_s15, 4  }
 0x432   :  { %13 = sbr.rel (!%p11_p4) target bundleno = 1 (0x1), region = 70 }

</bundles_post_ra>
